<compile_context>
chip_gen: v7x
topology: tpu7x:2x2x1
jax: 0.10.0
libtpu: 0.0.40
codegen_flags: <defaults>
</compile_context>

<pallas_src>
import jax
import jax.numpy as jnp
from jax.experimental import pallas as pl
from jax.experimental.pallas import tpu as pltpu


def _lidar_ray_kernel(t_ref, lidar_ref, out_ref):
    # t_ref:     (BS, 16)  SMEM scalar-prefetch, row-major flattened 4x4 T
    # lidar_ref: (1, C, tileN) VMEM, rows 0..2 are x, y, z
    # out_ref:   (1, 4, tileN) VMEM, rows 0..2 directions, row 3 distance
    b = pl.program_id(0)
    dtype = out_ref.dtype

    x = lidar_ref[0, 0:1, :]                       # (1, tileN)
    y = lidar_ref[0, 1:2, :]
    z = lidar_ref[0, 2:3, :]

    # 16 scalar SMEM reads of this batch's transform (free scalar slot).
    t = [t_ref[b, i] for i in range(16)]

    # Homogeneous transform of lidar points: coords = (T @ [x;y;z;1]) / w.
    w = t[12] * x + t[13] * y + t[14] * z + t[15]  # (1, tileN)
    inv_w = jnp.asarray(1.0, dtype) / w
    cx = (t[0] * x + t[1] * y + t[2] * z + t[3]) * inv_w
    cy = (t[4] * x + t[5] * y + t[6] * z + t[7]) * inv_w
    cz = (t[8] * x + t[9] * y + t[10] * z + t[11]) * inv_w

    # Ray origin = T @ [0,0,0,1]^T = last column of T, perspective divided
    # (per-batch scalars; the full broadcast origin is produced in the wrapper).
    ow = t[15]
    ox = t[3] / ow
    oy = t[7] / ow
    oz = t[11] / ow

    dx = cx - ox
    dy = cy - oy
    dz = cz - oz
    dist = jnp.sqrt(dx * dx + dy * dy + dz * dz)   # (1, tileN)
    # F.normalize semantics: v / max(||v||_2, eps), eps = 1e-12
    inv_n = jnp.asarray(1.0, dtype) / jnp.maximum(dist, jnp.asarray(1e-12, dtype))

    # Direct row stores (no concatenate temp).
    out_ref[0, 0:1, :] = dx * inv_n
    out_ref[0, 1:2, :] = dy * inv_n
    out_ref[0, 2:3, :] = dz * inv_n
    out_ref[0, 3:4, :] = dist


def _pick_tile_n(N, cap=8192):
    if N <= cap:
        return N
    for t in (8192, 4096, 2048, 1024, 512, 384, 256, 128):
        if N % t == 0:
            return t
    return N  # block == full array dim is always legal


def lidar_ray_sampler(T, lidar, *, n_pts_per_ray, min_depth, max_depth, tile_n=None):
    """Returns (origins, directions, lengths, distances) matching the torch module.

    T:     (BS, 4, 4) float32 lidar-to-world transforms
    lidar: (BS, C, N) float32, C >= 3, first three channels are x, y, z
    """
    BS, C, N = lidar.shape
    assert C >= 3
    step = (max_depth - min_depth) / n_pts_per_ray
    assert step > 0
    dtype = T.dtype

    # Don't DMA unused channels when there are many of them.
    if C > 4:
        lidar = lidar[:, :3, :]
        C = 3

    if tile_n is None:
        tile_n = _pick_tile_n(N)
    assert N % tile_n == 0

    t_flat = T.reshape(BS, 16).astype(dtype)       # scalar-prefetch operand (SMEM)

    out = pl.pallas_call(
        _lidar_ray_kernel,
        out_shape=jax.ShapeDtypeStruct((BS, 4, N), dtype),
        grid_spec=pltpu.PrefetchScalarGridSpec(
            num_scalar_prefetch=1,
            grid=(BS, N // tile_n),
            in_specs=[
                pl.BlockSpec((1, C, tile_n), lambda b, n, t: (b, 0, n)),
            ],
            out_specs=pl.BlockSpec((1, 4, tile_n), lambda b, n, t: (b, 0, n)),
        ),
        compiler_params=pltpu.CompilerParams(
            dimension_semantics=("parallel", "parallel")
        ),
    )(t_flat, lidar)

    # Data-dependent results from the kernel (lane-dense), converted to the
    # PyTorch (BS, N, 3) convention by the wrapper (pure layout glue).
    directions = jnp.transpose(out[:, 0:3, :], (0, 2, 1))   # (BS, N, 3)
    distances = out[:, 3, :]                                # (BS, N)

    # Data-independent results computed outside the kernel (perf review):
    # origin = (T @ [0,0,0,1]) perspective-divided, broadcast over points.
    origin = T[:, :3, 3] / T[:, 3:4, 3]                     # (BS, 3)
    origins = jnp.broadcast_to(origin[:, None, :], (BS, N, 3))
    # lengths = arange(min_depth, max_depth, step) broadcast over all rays.
    lengths_1d = jnp.arange(min_depth, max_depth, step, dtype=dtype)
    lengths = jnp.broadcast_to(lengths_1d, (BS, N, lengths_1d.shape[0]))

    # RayBundle(origins, directions, lengths, xys=None) -> returned as a tuple;
    # xys is always None in the reference module.
    return origins, directions, lengths, distances


def _reference(T, lidar, n_pts, min_d, max_d):
    """Pure-JAX transcription of the PyTorch forward, for validation."""
    BS, _, N = lidar.shape
    step = (max_d - min_d) / n_pts
    origin = jnp.array([0.0, 0.0, 0.0, 1.0], T.dtype).reshape(1, 4, 1)
    origin = T @ origin
    origin = origin[:, :3] / origin[:, 3:]
    origin = jnp.broadcast_to(jnp.transpose(origin, (0, 2, 1)), (BS, N, 3))
    coords = lidar[:, :3]
    ones = jnp.ones((BS, 1, N), T.dtype)
    coords = jnp.concatenate([coords, ones], axis=1)
    coords = T @ coords
    coords = coords[:, :3] / coords[:, 3:]
    coords = jnp.transpose(coords, (0, 2, 1))
    dirs = coords - origin
    dist = jnp.linalg.norm(dirs, axis=2)
    dirs = dirs / jnp.maximum(dist[..., None], 1e-12)
    lengths = jnp.broadcast_to(
        jnp.arange(min_d, max_d, step, dtype=T.dtype), (BS, N, n_pts)
    )
    return origin, dirs, lengths, dist


if __name__ == "__main__":
    BS, C, N = 2, 4, 512
    n_pts_per_ray = 8
    min_depth, max_depth = 0.5, 8.5   # step = 1.0 (exactly representable)

    key = jax.random.PRNGKey(0)
    k_trans, k_lidar = jax.random.split(key)

    # Deterministic lidar-to-world transforms: rotation about z + translation.
    angles = jnp.array([0.3, -0.7], dtype=jnp.float32)
    trans = jax.random.normal(k_trans, (BS, 3), dtype=jnp.float32) * 2.0

    def make_T(a, t):
        c, s = jnp.cos(a), jnp.sin(a)
        R = jnp.array([[c, -s, 0.0], [s, c, 0.0], [0.0, 0.0, 1.0]], dtype=jnp.float32)
        top = jnp.concatenate([R, t.reshape(3, 1)], axis=1)
        bottom = jnp.array([[0.0, 0.0, 0.0, 1.0]], dtype=jnp.float32)
        return jnp.concatenate([top, bottom], axis=0)

    T = jnp.stack([make_T(angles[i], trans[i]) for i in range(BS)], axis=0)  # (BS,4,4)

    # Lidar points: (BS, C, N), channels = (x, y, z, intensity).
    lidar = jax.random.normal(k_lidar, (BS, C, N), dtype=jnp.float32) * 5.0

    origins, directions, lengths, distances = lidar_ray_sampler(
        T, lidar,
        n_pts_per_ray=n_pts_per_ray,
        min_depth=min_depth,
        max_depth=max_depth,
    )
    jax.block_until_ready((origins, directions, lengths, distances))

    r_org, r_dir, r_len, r_dist = _reference(
        T, lidar, n_pts_per_ray, min_depth, max_depth
    )

    assert origins.shape == (BS, N, 3)
    assert directions.shape == (BS, N, 3)
    assert lengths.shape == (BS, N, n_pts_per_ray)
    assert distances.shape == (BS, N)

    assert jnp.allclose(origins, r_org, rtol=1e-5, atol=1e-5)
    assert jnp.allclose(directions, r_dir, rtol=1e-5, atol=1e-5)
    assert jnp.allclose(lengths, r_len, rtol=1e-5, atol=1e-5)
    assert jnp.allclose(distances, r_dist, rtol=1e-5, atol=1e-5)

    print("KERNEL_OK")
</pallas_src>

<mosaic_0001>
module attributes {stable_mosaic.version = 11 : i64} {
  func.func @_lidar_ray_kernel(%arg0: i32, %arg1: i32, %arg2: memref<2x16xf32, #tpu.memory_space<smem>>, %arg3: memref<1x4x512xf32, #tpu.memory_space<vmem>>, %arg4: memref<1x4x512xf32, #tpu.memory_space<vmem>>) attributes {dimension_semantics = [#tpu.dimension_semantics<parallel>, #tpu.dimension_semantics<parallel>], iteration_bounds = array<i64: 2, 1>, scalar_prefetch = 1 : i64, scratch_operands = 0 : i64, tpu.core_type = #tpu.core_type<tc>, window_params = [{transform_indices = @transform_0, window_bounds = array<i64: 1, 4, 512>}, {transform_indices = @transform_1, window_bounds = array<i64: 1, 4, 512>}]} {
    %c0 = arith.constant 0 : index
    %c0_0 = arith.constant 0 : index
    %c0_1 = arith.constant 0 : index
    %0 = vector.load %arg3[%c0, %c0_0, %c0_1] : memref<1x4x512xf32, #tpu.memory_space<vmem>>, vector<1x1x512xf32>
    %1 = vector.shape_cast %0 : vector<1x1x512xf32> to vector<1x512xf32>
    %c0_2 = arith.constant 0 : index
    %c1 = arith.constant 1 : index
    %c0_3 = arith.constant 0 : index
    %2 = vector.load %arg3[%c0_2, %c1, %c0_3] : memref<1x4x512xf32, #tpu.memory_space<vmem>>, vector<1x1x512xf32>
    %3 = vector.shape_cast %2 : vector<1x1x512xf32> to vector<1x512xf32>
    %c0_4 = arith.constant 0 : index
    %c2 = arith.constant 2 : index
    %c0_5 = arith.constant 0 : index
    %4 = vector.load %arg3[%c0_4, %c2, %c0_5] : memref<1x4x512xf32, #tpu.memory_space<vmem>>, vector<1x1x512xf32>
    %5 = vector.shape_cast %4 : vector<1x1x512xf32> to vector<1x512xf32>
    %6 = arith.index_cast %arg0 : i32 to index
    %c0_6 = arith.constant 0 : index
    %7 = memref.load %arg2[%6, %c0_6] : memref<2x16xf32, #tpu.memory_space<smem>>
    %8 = arith.index_cast %arg0 : i32 to index
    %c1_7 = arith.constant 1 : index
    %9 = memref.load %arg2[%8, %c1_7] : memref<2x16xf32, #tpu.memory_space<smem>>
    %10 = arith.index_cast %arg0 : i32 to index
    %c2_8 = arith.constant 2 : index
    %11 = memref.load %arg2[%10, %c2_8] : memref<2x16xf32, #tpu.memory_space<smem>>
    %12 = arith.index_cast %arg0 : i32 to index
    %c3 = arith.constant 3 : index
    %13 = memref.load %arg2[%12, %c3] : memref<2x16xf32, #tpu.memory_space<smem>>
    %14 = arith.index_cast %arg0 : i32 to index
    %c4 = arith.constant 4 : index
    %15 = memref.load %arg2[%14, %c4] : memref<2x16xf32, #tpu.memory_space<smem>>
    %16 = arith.index_cast %arg0 : i32 to index
    %c5 = arith.constant 5 : index
    %17 = memref.load %arg2[%16, %c5] : memref<2x16xf32, #tpu.memory_space<smem>>
    %18 = arith.index_cast %arg0 : i32 to index
    %c6 = arith.constant 6 : index
    %19 = memref.load %arg2[%18, %c6] : memref<2x16xf32, #tpu.memory_space<smem>>
    %20 = arith.index_cast %arg0 : i32 to index
    %c7 = arith.constant 7 : index
    %21 = memref.load %arg2[%20, %c7] : memref<2x16xf32, #tpu.memory_space<smem>>
    %22 = arith.index_cast %arg0 : i32 to index
    %c8 = arith.constant 8 : index
    %23 = memref.load %arg2[%22, %c8] : memref<2x16xf32, #tpu.memory_space<smem>>
    %24 = arith.index_cast %arg0 : i32 to index
    %c9 = arith.constant 9 : index
    %25 = memref.load %arg2[%24, %c9] : memref<2x16xf32, #tpu.memory_space<smem>>
    %26 = arith.index_cast %arg0 : i32 to index
    %c10 = arith.constant 10 : index
    %27 = memref.load %arg2[%26, %c10] : memref<2x16xf32, #tpu.memory_space<smem>>
    %28 = arith.index_cast %arg0 : i32 to index
    %c11 = arith.constant 11 : index
    %29 = memref.load %arg2[%28, %c11] : memref<2x16xf32, #tpu.memory_space<smem>>
    %30 = arith.index_cast %arg0 : i32 to index
    %c12 = arith.constant 12 : index
    %31 = memref.load %arg2[%30, %c12] : memref<2x16xf32, #tpu.memory_space<smem>>
    %32 = arith.index_cast %arg0 : i32 to index
    %c13 = arith.constant 13 : index
    %33 = memref.load %arg2[%32, %c13] : memref<2x16xf32, #tpu.memory_space<smem>>
    %34 = arith.index_cast %arg0 : i32 to index
    %c14 = arith.constant 14 : index
    %35 = memref.load %arg2[%34, %c14] : memref<2x16xf32, #tpu.memory_space<smem>>
    %36 = arith.index_cast %arg0 : i32 to index
    %c15 = arith.constant 15 : index
    %37 = memref.load %arg2[%36, %c15] : memref<2x16xf32, #tpu.memory_space<smem>>
    %38 = vector.broadcast %31 : f32 to vector<1x512xf32>
    %39 = arith.mulf %38, %1 : vector<1x512xf32>
    %40 = vector.broadcast %33 : f32 to vector<1x512xf32>
    %41 = arith.mulf %40, %3 : vector<1x512xf32>
    %42 = arith.addf %39, %41 : vector<1x512xf32>
    %43 = vector.broadcast %35 : f32 to vector<1x512xf32>
    %44 = arith.mulf %43, %5 : vector<1x512xf32>
    %45 = arith.addf %42, %44 : vector<1x512xf32>
    %46 = vector.broadcast %37 : f32 to vector<1x512xf32>
    %47 = arith.addf %45, %46 : vector<1x512xf32>
    %cst = arith.constant 1.000000e+00 : f32
    %48 = vector.broadcast %cst : f32 to vector<1x512xf32>
    %49 = arith.divf %48, %47 : vector<1x512xf32>
    %50 = vector.broadcast %7 : f32 to vector<1x512xf32>
    %51 = arith.mulf %50, %1 : vector<1x512xf32>
    %52 = vector.broadcast %9 : f32 to vector<1x512xf32>
    %53 = arith.mulf %52, %3 : vector<1x512xf32>
    %54 = arith.addf %51, %53 : vector<1x512xf32>
    %55 = vector.broadcast %11 : f32 to vector<1x512xf32>
    %56 = arith.mulf %55, %5 : vector<1x512xf32>
    %57 = arith.addf %54, %56 : vector<1x512xf32>
    %58 = vector.broadcast %13 : f32 to vector<1x512xf32>
    %59 = arith.addf %57, %58 : vector<1x512xf32>
    %60 = arith.mulf %59, %49 : vector<1x512xf32>
    %61 = vector.broadcast %15 : f32 to vector<1x512xf32>
    %62 = arith.mulf %61, %1 : vector<1x512xf32>
    %63 = vector.broadcast %17 : f32 to vector<1x512xf32>
    %64 = arith.mulf %63, %3 : vector<1x512xf32>
    %65 = arith.addf %62, %64 : vector<1x512xf32>
    %66 = vector.broadcast %19 : f32 to vector<1x512xf32>
    %67 = arith.mulf %66, %5 : vector<1x512xf32>
    %68 = arith.addf %65, %67 : vector<1x512xf32>
    %69 = vector.broadcast %21 : f32 to vector<1x512xf32>
    %70 = arith.addf %68, %69 : vector<1x512xf32>
    %71 = arith.mulf %70, %49 : vector<1x512xf32>
    %72 = vector.broadcast %23 : f32 to vector<1x512xf32>
    %73 = arith.mulf %72, %1 : vector<1x512xf32>
    %74 = vector.broadcast %25 : f32 to vector<1x512xf32>
    %75 = arith.mulf %74, %3 : vector<1x512xf32>
    %76 = arith.addf %73, %75 : vector<1x512xf32>
    %77 = vector.broadcast %27 : f32 to vector<1x512xf32>
    %78 = arith.mulf %77, %5 : vector<1x512xf32>
    %79 = arith.addf %76, %78 : vector<1x512xf32>
    %80 = vector.broadcast %29 : f32 to vector<1x512xf32>
    %81 = arith.addf %79, %80 : vector<1x512xf32>
    %82 = arith.mulf %81, %49 : vector<1x512xf32>
    %83 = arith.divf %13, %37 : f32
    %84 = arith.divf %21, %37 : f32
    %85 = arith.divf %29, %37 : f32
    %86 = vector.broadcast %83 : f32 to vector<1x512xf32>
    %87 = arith.subf %60, %86 : vector<1x512xf32>
    %88 = vector.broadcast %84 : f32 to vector<1x512xf32>
    %89 = arith.subf %71, %88 : vector<1x512xf32>
    %90 = vector.broadcast %85 : f32 to vector<1x512xf32>
    %91 = arith.subf %82, %90 : vector<1x512xf32>
    %92 = arith.mulf %87, %87 : vector<1x512xf32>
    %93 = arith.mulf %89, %89 : vector<1x512xf32>
    %94 = arith.addf %92, %93 : vector<1x512xf32>
    %95 = arith.mulf %91, %91 : vector<1x512xf32>
    %96 = arith.addf %94, %95 : vector<1x512xf32>
    %97 = math.sqrt %96 : vector<1x512xf32>
    %cst_9 = arith.constant 9.99999996E-13 : f32
    %98 = vector.broadcast %cst_9 : f32 to vector<1x512xf32>
    %99 = arith.maximumf %97, %98 : vector<1x512xf32>
    %cst_10 = arith.constant 1.000000e+00 : f32
    %100 = vector.broadcast %cst_10 : f32 to vector<1x512xf32>
    %101 = arith.divf %100, %99 : vector<1x512xf32>
    %102 = arith.mulf %87, %101 : vector<1x512xf32>
    %c0_11 = arith.constant 0 : index
    %c0_12 = arith.constant 0 : index
    %c0_13 = arith.constant 0 : index
    %103 = vector.load %arg4[%c0_11, %c0_12, %c0_13] : memref<1x4x512xf32, #tpu.memory_space<vmem>>, vector<1x1x512xf32>
    %104 = vector.shape_cast %103 : vector<1x1x512xf32> to vector<1x512xf32>
    %105 = vector.shape_cast %102 : vector<1x512xf32> to vector<1x1x512xf32>
    tpu.vector_store %arg4[%c0_11, %c0_12, %c0_13], %105 {strides = array<i32>} : memref<1x4x512xf32, #tpu.memory_space<vmem>>, vector<1x1x512xf32>,
    %106 = arith.mulf %89, %101 : vector<1x512xf32>
    %c0_14 = arith.constant 0 : index
    %c1_15 = arith.constant 1 : index
    %c0_16 = arith.constant 0 : index
    %107 = vector.load %arg4[%c0_14, %c1_15, %c0_16] : memref<1x4x512xf32, #tpu.memory_space<vmem>>, vector<1x1x512xf32>
    %108 = vector.shape_cast %107 : vector<1x1x512xf32> to vector<1x512xf32>
    %109 = vector.shape_cast %106 : vector<1x512xf32> to vector<1x1x512xf32>
    tpu.vector_store %arg4[%c0_14, %c1_15, %c0_16], %109 {strides = array<i32>} : memref<1x4x512xf32, #tpu.memory_space<vmem>>, vector<1x1x512xf32>,
    %110 = arith.mulf %91, %101 : vector<1x512xf32>
    %c0_17 = arith.constant 0 : index
    %c2_18 = arith.constant 2 : index
    %c0_19 = arith.constant 0 : index
    %111 = vector.load %arg4[%c0_17, %c2_18, %c0_19] : memref<1x4x512xf32, #tpu.memory_space<vmem>>, vector<1x1x512xf32>
    %112 = vector.shape_cast %111 : vector<1x1x512xf32> to vector<1x512xf32>
    %113 = vector.shape_cast %110 : vector<1x512xf32> to vector<1x1x512xf32>
    tpu.vector_store %arg4[%c0_17, %c2_18, %c0_19], %113 {strides = array<i32>} : memref<1x4x512xf32, #tpu.memory_space<vmem>>, vector<1x1x512xf32>,
    %c0_20 = arith.constant 0 : index
    %c3_21 = arith.constant 3 : index
    %c0_22 = arith.constant 0 : index
    %114 = vector.load %arg4[%c0_20, %c3_21, %c0_22] : memref<1x4x512xf32, #tpu.memory_space<vmem>>, vector<1x1x512xf32>
    %115 = vector.shape_cast %114 : vector<1x1x512xf32> to vector<1x512xf32>
    %116 = vector.shape_cast %97 : vector<1x512xf32> to vector<1x1x512xf32>
    tpu.vector_store %arg4[%c0_20, %c3_21, %c0_22], %116 {strides = array<i32>} : memref<1x4x512xf32, #tpu.memory_space<vmem>>, vector<1x1x512xf32>,
    return
  }
  func.func @transform_0(%arg0: i32, %arg1: i32, %arg2: memref<2x16xf32, #tpu.memory_space<smem>>) -> (i32, i32, i32) {
    %c0_i32 = arith.constant 0 : i32
    %c0_i32_0 = arith.constant 0 : i32
    return %arg0, %c0_i32, %arg1 : i32, i32, i32
  }
  func.func @transform_1(%arg0: i32, %arg1: i32, %arg2: memref<2x16xf32, #tpu.memory_space<smem>>) -> (i32, i32, i32) {
    %c0_i32 = arith.constant 0 : i32
    %c0_i32_0 = arith.constant 0 : i32
    return %arg0, %c0_i32, %arg1 : i32, i32, i32
  }
}

</mosaic_0001>

<bundles_post_ra>
// kernel: tpu_custom_call.1
= control target key start
LH: loop header
LB: loop body
LE: loop exit
PB: predicated region body
PF: predicated region fallthrough
CT: control target
= control target key end

     0   :  { %s865_s0 = inlined_call_operand.hbm [shape: f32[2,16], index: 0, kind: input, shape index: {}]   ;;  %s866_s1 = inlined_call_operand.hbm [shape: f32[2,4,512], index: 1, kind: input, shape index: {}]   ;;  %s867_s2 = inlined_call_operand.hbm [shape: f32[2,4,512], index: 2, kind: output, shape index: {}]  }
   0x1   :  { %s484_s11 = scalar_lea.hbm %s865_s0, 32 }
   0x2   :  { %p485_p0 = scmp.ne.s32.totalorder %s865_s0, %s484_s11  ;;  %p488_p1 = scmp.lt.u32.totalorder %s484_s11, %s865_s0 }
   0x4   :  { %p490_p2 = pnand %p488_p1, %p485_p0 }
   0x6   :  { %493 = shalt.err (!%p490_p2)  }
   0x7   :  { %s610_s16 = smov [#allocation3]  }
   0x8   :  { %8 = dma.hbm_to_smem %s865_s0, 32, %s610_s16, [#allocation2] }
   0x9   :  { %576 = dma.done.wait [#allocation2], 32 }
   0xa   :  { %577 = vsyncadd [#allocation2], 4294967264 }
   0xb   :  { %10 = sfence }
   0xc   :  { %11 = vsyncpa [#allocation5], 0 }
   0xd   :  { %13 = vsyncpa [#allocation5 + $0x1], 0 }
   0xe   :  { %14 = vsyncpa [#allocation6], 0 }
   0xf   :  { %16 = vsyncpa [#allocation6 + $0x1], 0  ;;  %s640_s19 = smov 0   ;;  %s642_s20 = smov 0  }
  0x10   :  { %s644_s21 = smov 0   ;;  %s646_s22 = smov 0  }
  0x11   :  { %s648_s23 = smov 0   ;;  %s650_s24 = smov 0  }
  0x12 LB: > { %s388_s0 = sadd.s32 4294967295, %s608_s24   ;;  %s389_s25 = sadd.s32 4294967294, %s608_s24   ;;  %s608_s24 = sphi %s650_s24, %s22_s24   ;;  %s604_s23 = sphi %s648_s23, %s887_s23   ;;  %s600_s22 = sphi %s646_s22, %s886_s22   ;;  %s596_s21 = sphi %s644_s21, %s885_s21   ;;  %s592_s20 = sphi %s642_s20, %s884_s20   ;;  %s588_s19 = sphi %s640_s19, %s883_s19  }
  0x13   : > { %s34_s26 = sadd.s32 1, %s604_s23  ;;  %s43_s27 = sadd.s32 1, %s596_s21 }
  0x14   : > { %p36_p3 = scmp.ge.s32.totalorder %s34_s26, 2  ;;  %p50_p4 = scmp.ne.s32.totalorder %s596_s21, %s592_s20 }
  0x15   : > { %p51_p5 = scmp.eq.s32.totalorder %s608_s24, 0  ;;  %p56_p6 = scmp.ne.s32.totalorder %s592_s20, %s588_s19 }
  0x16   : > { %s889_s26 = smov (%p36_p3, %s34_s26), 0  ;;  %p57_p8 = scmp.eq.s32.totalorder %s388_s0, 0 }
  0x17   : > { %p681_p7 = por %p51_p5, %p50_p4  ;;  %s38_s29 = ssub.s32 %s604_s23, %s889_s26 }
  0x18   : > { %p82_p9 = scmp.eq.s32.totalorder %s388_s0, 1  ;;  %p41_p10 = scmp.eq.s32.totalorder %s38_s29, 0 }
  0x19   : > { %p687_p11 = por %p57_p8, %p56_p6  ;;  %p88_p13 = scmp.eq.s32.totalorder %s389_s25, 1 }
  0x1a   : > { %p691_p12 = por %p82_p9, %p50_p4  ;;  %p425_p2 = scmp.lt.s32.totalorder %s608_s24, 2 }
  0x1b   : > { %s696_s4 = scalar_select %p41_p10, %s596_s21, %s43_s27  }
  0x1c   : > { %s872_s3 = scalar_select %p691_p12, 1, 0 }
  0x1d   : > { %p698_p0 = por %p88_p13, %p56_p6  ;;  %s108_s6 = sand.u32 1, %s596_s21  }
  0x1e   : > { %s392_s7 = sshll.u32 %s108_s6, 4  ;;  %s409_s8 = sshll.u32 %s604_s23, 8 }
  0x1f   : > { %s873_s5 = scalar_select %p698_p0, 1, 0 }
  0x20   : > { %s709_s11 = scalar_lea.hbm %s866_s1, %s409_s8  ;;  %s112_s12 = scalar_lea.vmem [#allocation4], %s392_s7 }
  0x21   : > { %s122_s13 = sshll.u32 %s112_s12, 4  ;;  %p715_p3 = pnand %p425_p2, %p681_p7  ;;  %s711_s13 = int_to_ptr.vmem [resolvable:$true] %s122_s13 }
  0x22   : > { %s109_s15 = scalar_lea.sflag [#allocation5], %s108_s6  ;;  %s494_s16 = scalar_lea.hbm %s709_s11, 256 }
  0x23   : > { %p495_p6 = scmp.ne.s32.totalorder %s709_s11, %s494_s16  ;;  %p496_p8 = pneg %p715_p3 }
  0x24   : > { %s499_s0 = scalar_lea.hbm %s866_s1, 512  ;;  %p500_p7 = scmp.lt.u32.totalorder %s709_s11, %s866_s1 }
  0x25   : > { %p497_p9 = pnand %p496_p8, %p495_p6  ;;  %p501_p13 = scmp.lt.u32.totalorder %s499_s0, %s494_s16 }
  0x26   : > { %p503_p1 = scmp.lt.u32.totalorder %s494_s16, %s709_s11 }
  0x27   : > { %p498_p10 = pneg %p497_p9  ;;  %p502_p2 = por %p501_p13, %p500_p7 }
  0x29   : > { %p504_p4 = por %p503_p1, %p502_p2 }
  0x2b   : > { %p505_p5 = pnand %p504_p4, %p498_p10 }
  0x2d   : > { %508 = shalt.err (!%p505_p5)
}
  0x2e   : > { %s509_s28 = scalar_lea.vmem %s711_s13, 256  ;;  %s611_s29 = smov [#allocation4]  }
  0x2f   : > { %p510_p6 = scmp.ne.s32.totalorder %s711_s13, %s509_s28  ;;  %s514_s6 = sshll.u32 %s611_s29, 4  ;;  %s515_s6 = int_to_ptr.vmem [resolvable:$false] %s514_s6 }
  0x30   : > { %s516_s7 = scalar_lea.vmem %s515_s6, 512  ;;  %p517_p12 = scmp.lt.s32.totalorder %s711_s13, %s515_s6 }
  0x31   : > { %p512_p9 = pnand %p510_p6, %p496_p8  ;;  %p518_p7 = scmp.lt.s32.totalorder %s516_s7, %s509_s28 }
  0x33   : > { %p513_p0 = pneg %p512_p9  ;;  %p519_p13 = por %p518_p7, %p517_p12 }
  0x35   : > { %p520_p1 = pnand %p519_p13, %p513_p0 }
  0x37   : > { %523 = shalt.err (!%p520_p1)
}
  0x38   : > { %420 = dma.hbm_to_vmem [thread:$0]  (!%p715_p3), %s709_s11, 256, %s711_s13, %s109_s15  }
  0x39   : > { %p875_p4 = scmp.lt.s32.totalorder %s608_s24, 3  ;;  %p876_p5 = scmp.ge.s32.totalorder %s608_s24, 1 }
  0x3b   : > { %p128_p8 = pnand %p876_p5, %p875_p4 }
  0x3c   : > { %s751_s8 = sand.u32 (!%p128_p8), 1, %s592_s20  }
  0x3d   : > { %131 = sbr.rel (%p128_p8) target bundleno = 196 (0xc4), region = 24  ;;  %s869_s9 = sshll.u32 (!%p128_p8), %s751_s8, 4 }
  0x3e   : > { %s134_s10 = scalar_lea.sflag (!%p128_p8), [#allocation5], %s751_s8  ;;  %s137_s12 = scalar_lea.vmem (!%p128_p8), [#allocation4], %s869_s9 }
  0x44   : > { %579 = dma.done.wait (%p687_p11), %s134_s10, 256  }
  0x45   : > { %581 = vsyncadd (%p687_p11), %s134_s10, 4294967040  ;;  %s762_s11 = sshll.u32 %s600_s22, 7  ;;  %v158_v2 = vld [vmem:[%s137_s12] ss:$4 sm:$0xf]  ;;  %v274_v59 = vlaneseq  ;;  %p880_p12 = scmp.ne.s32.totalorder %s872_s3, 0 }
  0x46   : > { %s193_s13 = sadd.s32 15, %s762_s11  ;;  %s187_s30 = sadd.s32 12, %s762_s11  ;;  %v398_v3 = vld [vmem:[%s137_s12 + $0x1] ss:$4 sm:$0xf] }
  0x47   : > { %s765_s14 = sld [smem:[#allocation3 + %s193_s13]]  ;;  %s189_s15 = sadd.s32 13, %s762_s11  ;;  %v399_v8 = vld [vmem:[%s137_s12 + $0x2] ss:$4 sm:$0xf]  ;;  %vm798_vm1 = vcmp.lt.s32.totalorder %v274_v59, 512 }
  0x48   : > { %s188_s16 = sld [smem:[#allocation3 + %s187_s30]]  ;;  %s191_s18 = sadd.s32 14, %s762_s11 }
  0x49   : > { %s190_s17 = sld [smem:[#allocation3 + %s189_s15]]  ;;  %s165_s25 = sadd.s32 1, %s762_s11 }
  0x4a   : > { %s192_s0 = sld [smem:[#allocation3 + %s191_s18]]  ;;  %s171_s28 = sadd.s32 4, %s762_s11 }
  0x4b   : > { %s773_s27 = sld [smem:[#allocation3 + %s762_s11]]  ;;  %s173_s6 = sadd.s32 5, %s762_s11 }
  0x4c   : > { %s166_s29 = sld [smem:[#allocation3 + %s165_s25]]  ;;  %s179_s7 = sadd.s32 8, %s762_s11 }
  0x4d   : > { %v203_v0 = vstv %s765_s14  ;;  %s181_s10 = sadd.s32 9, %s762_s11  ;;  %s167_s13 = sadd.s32 2, %s762_s11 }
  0x4e   : > { %476 = vrcp.f32 %v203_v0  ;;  %v195_v4 = vstv %s188_s16  ;;  %s172_s14 = sld [smem:[#allocation3 + %s171_s28]]  ;;  %s175_s15 = sadd.s32 6, %s762_s11 }
  0x4f   : > { %v197_v5 = vstv %s190_s17  ;;  %v196_v6 = vmul.f32 %v195_v4, %v158_v2  ;;  %s174_s30 = sld [smem:[#allocation3 + %s173_s6]]  ;;  %s183_s18 = sadd.s32 10, %s762_s11 }
  0x50   : > { %v198_v7 = vmul.f32 %v398_v3, %v197_v5  ;;  %v200_v9 = vstv %s192_s0  ;;  %s180_s16 = sld [smem:[#allocation3 + %s179_s7]]  ;;  %s169_s0 = sadd.s32 3, %s762_s11 }
  0x51   : > { %v201_v11 = vmul.f32 %v399_v8, %v200_v9  ;;  %s182_s17 = sld [smem:[#allocation3 + %s181_s10]]  ;;  %v207_v13 = vstv %s773_s27  ;;  %s177_s28 = sadd.s32 7, %s762_s11 }
  0x52   : > { %v199_v10 = vadd.f32 %v198_v7, %v196_v6  ;;  %s168_s9 = sld [smem:[#allocation3 + %s167_s13]]  ;;  %v209_v14 = vstv %s166_s29  ;;  %s185_s6 = sadd.s32 11, %s762_s11  ;;  %v208_v20 = vmul.f32 %v207_v13, %v158_v2 }
  0x53   : > { %s176_s25 = sld [smem:[#allocation3 + %s175_s15]]  ;;  %v210_v21 = vmul.f32 %v398_v3, %v209_v14  ;;  %s410_s15 = sshll.u32 %s600_s22, 8 }
  0x54   : > { %v202_v12 = vadd.f32 %v201_v11, %v199_v10  ;;  %s184_s12 = sld [smem:[#allocation3 + %s183_s18]]  ;;  %v218_v15 = vstv %s172_s14  ;;  %s879_s14 = sshll.u32 %s751_s8, 4 }
  0x55   : > { %v220_v16 = vstv %s174_s30  ;;  %s786_s7 = sld [smem:[#allocation3 + %s169_s0]]  ;;  %v219_v23 = vmul.f32 %v218_v15, %v158_v2  ;;  %v211_v29 = vadd.f32 %v210_v21, %v208_v20  ;;  %s155_s30 = scalar_lea.vmem [#allocation7], %s879_s14 }
  0x56   : > { %v204_v17 = vadd.f32 %v203_v0, %v202_v12  ;;  %v229_v18 = vstv %s180_s16  ;;  %v221_v24 = vmul.f32 %v398_v3, %v220_v16  ;;  %s788_s10 = sld [smem:[#allocation3 + %s177_s28]]  ;;  %s304_s16 = sshll.u32 %s155_s30, 4  ;;  %s812_s16 = int_to_ptr.vmem [resolvable:$true] %s304_s16 }
  0x57   : > { %v231_v19 = vstv %s182_s17  ;;  %v230_v26 = vmul.f32 %v229_v18, %v158_v2  ;;  %s790_s27 = sld [smem:[#allocation3 + %s185_s6]]  ;;  %s288_s22 = scalar_lea.sflag [#allocation6], %s751_s8 }
  0x58   : > { %v477_v1 = vpop.eup %476  ;;  %v212_v22 = vstv %s168_s9  ;;  %v232_v27 = vmul.f32 %v398_v3, %v231_v19  ;;  %478 = vrcp.f32 %v204_v17  ;;  %v222_v31 = vadd.f32 %v221_v24, %v219_v23  ;;  %s612_s0 = smov [#allocation7]  }
  0x59   : > { %411 = vpush %v477_v1  ;;  %v223_v25 = vstv %s176_s25  ;;  %v213_v30 = vmul.f32 %v399_v8, %v212_v22  ;;  %s810_s25 = scalar_lea.hbm %s867_s2, %s410_s15  ;;  %s528_s28 = sshll.u32 %s612_s0, 4  ;;  %s529_s28 = int_to_ptr.vmem [resolvable:$false] %s528_s28 }
  0x5a   : > { %v234_v28 = vstv %s184_s12  ;;  %v224_v32 = vmul.f32 %v399_v8, %v223_v25  ;;  %v233_v33 = vadd.f32 %v232_v27, %v230_v26  ;;  %s524_s12 = scalar_lea.vmem %s812_s16, 256  ;;  %s530_s6 = scalar_lea.vmem %s529_s28, 512 }
  0x5b   : > { %v235_v34 = vmul.f32 %v399_v8, %v234_v28  ;;  %v214_v35 = vadd.f32 %v213_v30, %v211_v29  ;;  %v215_v36 = vstv %s786_s7  ;;  %p525_p11 = scmp.ne.s32.totalorder %s812_s16, %s524_s12  ;;  %p531_p10 = scmp.lt.s32.totalorder %s812_s16, %s529_s28 }
  0x5c   : > { %v225_v37 = vadd.f32 %v224_v32, %v222_v31  ;;  %v226_v38 = vstv %s788_s10  ;;  %p532_p2 = scmp.lt.s32.totalorder %s530_s6, %s524_s12 }
  0x5d   : > { %v236_v39 = vadd.f32 %v235_v34, %v233_v33  ;;  %v237_v40 = vstv %s790_s27  ;;  %v216_v41 = vadd.f32 %v215_v36, %v214_v35  ;;  %p526_p0 = pnand %p525_p11, %p880_p12 }
  0x5e   : > { %v227_v43 = vadd.f32 %v226_v38, %v225_v37  ;;  %p533_p6 = por %p532_p2, %p531_p10 }
  0x5f   : > { %v238_v44 = vadd.f32 %v237_v40, %v236_v39  ;;  %p527_p3 = pneg %p526_p0 }
  0x61   : > { %p534_p9 = pnand %p533_p6, %p527_p3 }
  0x62   : > { %v479_v42 = vpop.eup %478 }
  0x63   : > { %v217_v45 = vmul.f32 %v479_v42, %v216_v41  ;;  %v228_v46 = vmul.f32 %v479_v42, %v227_v43  ;;  %v239_v47 = vmul.f32 %v479_v42, %v238_v44 }
  0x8a   : > { %s412_s9 = spop %411 }
  0x8b   : > { %s243_s11 = smul.f32 %s412_s9, %s786_s7 }
  0x8c   : > { %s247_s29 = smul.f32 %s412_s9, %s788_s10 }
  0x8d   : > { %s251_s13 = smul.f32 %s412_s9, %s790_s27  ;;  %v252_v48 = vstv %s243_s11 }
  0x8e   : > { %v253_v49 = vsub.f32 %v217_v45, %v252_v48  ;;  %v254_v50 = vstv %s247_s29 }
  0x8f   : > { %v255_v51 = vsub.f32 %v228_v46, %v254_v50  ;;  %v256_v52 = vstv %s251_s13 }
  0x90   : > { %v257_v53 = vsub.f32 %v239_v47, %v256_v52  ;;  %v258_v54 = vmul.f32 %v253_v49, %v253_v49 }
  0x91   : > { %v259_v55 = vmul.f32 %v255_v51, %v255_v51 }
  0x92   : > { %v261_v57 = vmul.f32 %v257_v53, %v257_v53 }
  0x93   : > { %v260_v56 = vadd.f32 %v259_v55, %v258_v54 }
  0x95   : > { %v262_v58 = vadd.f32 %v261_v57, %v260_v56 }
  0x97   : > { %480 = vrsqrt.f32 %v262_v58  ;;  %vm265_vm0 = vcmp.eq.f32.partialorder %v262_v58, inf  ;;  %v268_v62 = vand.u32 2147483648, %v262_v58  ;;  %vm267_vm2 = vcmp.eq.f32.partialorder %v262_v58, 0.0 }
  0xa1   : > { %v481_v60 = vpop.eup %480 }
  0xa2   : > { %v264_v61 = vmul.f32 %v481_v60, %v262_v58 }
  0xa4   : > { %v266_v0 = vsel %vm265_vm0, %v262_v58, %v264_v61 }
  0xa5   : > { %v269_v1 = vsel %vm267_vm2, %v268_v62, %v266_v0 }
  0xa6   : > { %v270_v2 = vmax.f32 %v269_v1, 1e-12  ;;  %403 = vst.msk [vmem:[%s155_s30 + $0x3] ss:$4 sm:$0xf] %vm798_vm1, %v269_v1 }
  0xa8   : > { %482 = vrcp.f32 %v270_v2 }
  0xb2   : > { %v483_v3 = vpop.eup %482 }
  0xb3   : > { %v273_v4 = vmul.f32 %v483_v3, %v253_v49  ;;  %v279_v5 = vmul.f32 %v483_v3, %v255_v51  ;;  %v282_v6 = vmul.f32 %v483_v3, %v257_v53 }
  0xb5   : > { %278 = vst.msk [vmem:[%s155_s30] ss:$4 sm:$0xf] %vm798_vm1, %v273_v4  ;;  %401 = vst.msk [vmem:[%s155_s30 + $0x1] ss:$4 sm:$0xf] %vm798_vm1, %v279_v5 }
  0xb6   : > { %402 = vst.msk [vmem:[%s155_s30 + $0x2] ss:$4 sm:$0xf] %vm798_vm1, %v282_v6 }
  0xb7   : > { %537 = shalt.err (!%p534_p9)
}
  0xb8   : > { %s538_s8 = scalar_lea.hbm %s810_s25, 256  ;;  %s542_s27 = scalar_lea.hbm %s867_s2, 512 }
  0xb9   : > { %p539_p7 = scmp.ne.s32.totalorder %s810_s25, %s538_s8  ;;  %p543_p4 = scmp.lt.u32.totalorder %s810_s25, %s867_s2 }
  0xba   : > { %p544_p5 = scmp.lt.u32.totalorder %s542_s27, %s538_s8  ;;  %p546_p11 = scmp.lt.u32.totalorder %s538_s8, %s810_s25 }
  0xbb   : > { %p540_p13 = pnand %p539_p7, %p880_p12 }
  0xbc   : > { %p545_p8 = por %p544_p5, %p543_p4 }
  0xbd   : > { %p541_p1 = pneg %p540_p13 }
  0xbe   : > { %p547_p0 = por %p546_p11, %p545_p8 }
  0xc0   : > { %p548_p3 = pnand %p547_p0, %p541_p1 }
  0xc2   : > { %551 = shalt.err (!%p548_p3)
}
  0xc3   : > { %415 = dma.vmem_to_hbm [thread:$0]  (%p880_p12), %s812_s16, 256, %s810_s25, %s288_s22  }
  0xc4 PF: > { %s316_s29 = sand.u32 1, %s588_s19   ;;  %p881_p10 = scmp.ne.s32.totalorder %s873_s5, 0 }
  0xc5   : > { %p882_p2 = scmp.ge.s32.totalorder %s608_s24, 2  ;;  %s317_s13 = scalar_lea.sflag [#allocation6], %s316_s29 }
  0xc7   : > { %p422_p6 = pnand %p882_p2, %p881_p10 }
  0xc9   : > { %583 = dma.done.wait (!%p422_p6), %s317_s13, 256  }
  0xca   : > { %585 = vsyncadd (!%p422_p6), %s317_s13, 4294967040  ;;  %s22_s24 = sadd.s32 1, %s608_s24   ;;  %s883_s19 = smov %s592_s20 }
  0xcb   : > { %p19_p9 = scmp.ge.s32.totalorder %s22_s24, 4   ;;  %s884_s20 = smov %s596_s21 }
  0xcc   : > { %s885_s21 = smov %s696_s4  ;;  %s886_s22 = smov %s604_s23 }
  0xcd   : > { %s887_s23 = smov %s889_s26  ;;  %21 = sbr.rel (!%p19_p9) target bundleno = 18 (0x12), region = 74 }
  0xd4   :  { %322 = vsyncpa [#allocation5], 1 }
  0xd5   :  { %324 = vsyncpa [#allocation5 + $0x1], 1 }
  0xd6   :  { %325 = vsyncpa [#allocation6], 1 }
  0xd7   :  { %327 = vsyncpa [#allocation6 + $0x1], 1 }

</bundles_post_ra>
